<compile_context>
chip_gen: v7x
topology: tpu7x:2x2x1
jax: 0.10.0
libtpu: 0.0.40
codegen_flags: <defaults>
</compile_context>

<pallas_src>
from functools import partial

import jax
import jax.numpy as jnp
from jax.experimental import pallas as pl
from jax.experimental.pallas import tpu as pltpu


# ---------------------------------------------------------------------------
# Kernels
# ---------------------------------------------------------------------------
def _gcn_layers(a_raw, h0, w2, w3, o_ref, *, compute_dtype):
    """Shared 3-layer body.  h0 == X @ W1^T (already in compute_dtype)."""
    cd = compute_dtype
    a = a_raw.astype(cd)                                        # exact for 0/1+I

    # layer 1: relu(A @ (X @ W1^T))        (MXU, f32 accumulate; ReLU on f32)
    h = jnp.maximum(jnp.dot(a, h0, preferred_element_type=jnp.float32), 0.0)

    # layer 2: relu(A @ (h @ W2^T))        feature-first reassociation
    t = jnp.dot(h.astype(cd), w2, preferred_element_type=jnp.float32)
    h = jnp.maximum(jnp.dot(a, t.astype(cd),
                            preferred_element_type=jnp.float32), 0.0)

    # layer 3: A @ (h @ W3^T)              no activation
    t = jnp.dot(h.astype(cd), w3, preferred_element_type=jnp.float32)
    o_ref[...] = jnp.dot(a, t.astype(cd), preferred_element_type=jnp.float32)


def gcn_kernel_identity(a_ref, w1_ref, w2_ref, w3_ref, o_ref, *, compute_dtype):
    """X == I  =>  X @ W1^T == W1^T ; skip the X input and the first matmul."""
    _gcn_layers(a_ref[...], w1_ref[...].astype(compute_dtype),
                w2_ref[...], w3_ref[...], o_ref, compute_dtype=compute_dtype)


def gcn_kernel_general(a_ref, x_ref, w1_ref, w2_ref, w3_ref, o_ref, *,
                       compute_dtype):
    """General node features X."""
    h0 = jnp.dot(x_ref[...].astype(compute_dtype), w1_ref[...],
                 preferred_element_type=jnp.float32)
    _gcn_layers(a_ref[...], h0.astype(compute_dtype),
                w2_ref[...], w3_ref[...], o_ref, compute_dtype=compute_dtype)


# ---------------------------------------------------------------------------
# One-time weight prep (outside the hot path)
# ---------------------------------------------------------------------------
def prep_weights(W1, W2, W3, *, lane_pad=128, dtype=jnp.float32):
    """torch (out,in) -> (in,out), pad output/lane dims to `lane_pad`, cast.

    Returns ((W1p, W2p, W3p), d_out).  Zero padding is exact: relu(0)=0 and the
    padded weight rows are zero, so padded columns never contribute.
    """
    pad = lambda n: -(-n // lane_pad) * lane_pad
    d_in, h1 = W1.shape[1], W1.shape[0]
    h2, d_out = W2.shape[0], W3.shape[0]
    h1p, h2p, d_outp = pad(h1), pad(h2), pad(d_out)
    W1p = jnp.zeros((d_in, h1p), dtype).at[:, :h1].set(W1.T.astype(dtype))
    W2p = jnp.zeros((h1p, h2p), dtype).at[:h1, :h2].set(W2.T.astype(dtype))
    W3p = jnp.zeros((h2p, d_outp), dtype).at[:h2, :d_out].set(W3.T.astype(dtype))
    return (W1p, W2p, W3p), d_out


# ---------------------------------------------------------------------------
# Forward wrapper
# ---------------------------------------------------------------------------
def gcn_forward(A, weights, X=None, *, d_out, compute_dtype=jnp.float32):
    """A: (N,N) f32; weights from prep_weights; X=None => identity-feature path."""
    W1p, W2p, W3p = weights
    N = A.shape[0]
    h1p, h2p, d_outp = W1p.shape[1], W2p.shape[1], W3p.shape[1]

    if X is None:
        kernel = partial(gcn_kernel_identity, compute_dtype=compute_dtype)
        args = (A, W1p, W2p, W3p)
        extra_flops = 0
    else:
        kernel = partial(gcn_kernel_general, compute_dtype=compute_dtype)
        args = (A, X, W1p, W2p, W3p)
        extra_flops = 2 * N * X.shape[1] * h1p

    flops = extra_flops + 2 * N * (
        N * h1p + h1p * h2p + N * h2p + h2p * d_outp + N * d_outp)
    bytes_accessed = (sum(int(a.size) * a.dtype.itemsize for a in args)
                      + N * d_outp * 4)
    cost = pl.CostEstimate(flops=flops, transcendentals=0,
                           bytes_accessed=bytes_accessed)

    out_padded = pl.pallas_call(
        kernel,
        out_shape=jax.ShapeDtypeStruct((N, d_outp), jnp.float32),
        in_specs=[pl.BlockSpec(memory_space=pltpu.MemorySpace.VMEM)] * len(args),
        out_specs=pl.BlockSpec(memory_space=pltpu.MemorySpace.VMEM),
        cost_estimate=cost,
    )(*args)
    return out_padded[:, :d_out]          # drop lane padding outside the kernel


# ---------------------------------------------------------------------------
if __name__ == "__main__":
    # The original module builds A from a networkx graph + CSV; here we
    # synthesize a deterministic adjacency instead (no file / graph IO).
    key = jax.random.PRNGKey(0)
    ka, k1, k2, k3 = jax.random.split(key, 4)

    N = 64
    dim_in = N                 # X = torch.eye(N, X_dim) with X_dim = N
    dim_hid = dim_in // 2
    dim_out = 16

    # deterministic symmetric 0/1 adjacency with self loops
    rnd = jax.random.uniform(ka, (N, N))
    A = (rnd + rnd.T > 1.4).astype(jnp.float32) + jnp.eye(N, dtype=jnp.float32)

    # identity node features, exactly like torch.eye(N, X_dim)
    X = jnp.eye(N, dim_in, dtype=jnp.float32)

    # torch nn.Linear weights: shape (out_features, in_features), bias=False
    W1 = jax.random.normal(k1, (dim_in, dim_in), jnp.float32) * 0.1
    W2 = jax.random.normal(k2, (dim_hid, dim_in), jnp.float32) * 0.1
    W3 = jax.random.normal(k3, (dim_out, dim_hid), jnp.float32) * 0.1

    # pure-JAX reference of the PyTorch forward pass
    def ref(A, X, W1, W2, W3):
        h = jax.nn.relu((A @ X) @ W1.T)
        h = jax.nn.relu((A @ h) @ W2.T)
        return (A @ h) @ W3.T

    r = ref(A, X, W1, W2, W3)

    # f32 path, identity-feature fast path (X == I in the original module)
    wts_f32, d_out = prep_weights(W1, W2, W3, dtype=jnp.float32)
    out = jax.block_until_ready(gcn_forward(A, wts_f32, X=None, d_out=d_out))
    assert out.shape == (N, dim_out)
    assert jnp.allclose(out, r, atol=2e-4, rtol=2e-4)

    # general-X path (same math, exercises the X @ W1^T matmul)
    out_gen = jax.block_until_ready(gcn_forward(A, wts_f32, X=X, d_out=d_out))
    assert jnp.allclose(out_gen, r, atol=2e-4, rtol=2e-4)

    # bf16 MXU path (v6e/v7x-friendly; A is 0/1+I so exact in bf16, f32 accum)
    wts_bf16, _ = prep_weights(W1, W2, W3, dtype=jnp.bfloat16)
    out_bf16 = jax.block_until_ready(
        gcn_forward(A, wts_bf16, X=None, d_out=d_out,
                    compute_dtype=jnp.bfloat16))
    rel = jnp.linalg.norm(out_bf16 - r) / jnp.linalg.norm(r)
    assert rel < 5e-2

    print("KERNEL_OK")
</pallas_src>

<mosaic_0001>
module attributes {stable_mosaic.version = 11 : i64} {
  func.func @gcn_kernel_identity(%arg0: memref<64x64xf32, #tpu.memory_space<vmem>>, %arg1: memref<64x128xf32, #tpu.memory_space<vmem>>, %arg2: memref<128x128xf32, #tpu.memory_space<vmem>>, %arg3: memref<128x128xf32, #tpu.memory_space<vmem>>, %arg4: memref<64x128xf32, #tpu.memory_space<vmem>>) attributes {dimension_semantics = [], scalar_prefetch = 0 : i64, scratch_operands = 0 : i64, tpu.core_type = #tpu.core_type<tc>} {
    %c0 = arith.constant 0 : index
    %c0_0 = arith.constant 0 : index
    %0 = vector.load %arg0[%c0, %c0_0] : memref<64x64xf32, #tpu.memory_space<vmem>>, vector<64x64xf32>
    %c0_1 = arith.constant 0 : index
    %c0_2 = arith.constant 0 : index
    %1 = vector.load %arg1[%c0_1, %c0_2] : memref<64x128xf32, #tpu.memory_space<vmem>>, vector<64x128xf32>
    %c0_3 = arith.constant 0 : index
    %c0_4 = arith.constant 0 : index
    %2 = vector.load %arg2[%c0_3, %c0_4] : memref<128x128xf32, #tpu.memory_space<vmem>>, vector<128x128xf32>
    %c0_5 = arith.constant 0 : index
    %c0_6 = arith.constant 0 : index
    %3 = vector.load %arg3[%c0_5, %c0_6] : memref<128x128xf32, #tpu.memory_space<vmem>>, vector<128x128xf32>
    %cst = arith.constant dense<0.000000e+00> : vector<64x128xf32>
    %4 = tpu.matmul %0, %1, %cst {dimension_numbers = #tpu.dot_dimension_numbers<[1], [0], [0], [1], [0, 0, 1, 1], [], []>} : vector<64x64xf32>, vector<64x128xf32>, vector<64x128xf32> -> vector<64x128xf32>
    %cst_7 = arith.constant 0.000000e+00 : f32
    %5 = vector.broadcast %cst_7 : f32 to vector<64x128xf32>
    %6 = arith.maximumf %4, %5 : vector<64x128xf32>
    %cst_8 = arith.constant dense<0.000000e+00> : vector<64x128xf32>
    %7 = tpu.matmul %6, %2, %cst_8 {dimension_numbers = #tpu.dot_dimension_numbers<[1], [0], [0], [1], [0, 0, 1, 1], [], []>} : vector<64x128xf32>, vector<128x128xf32>, vector<64x128xf32> -> vector<64x128xf32>
    %cst_9 = arith.constant dense<0.000000e+00> : vector<64x128xf32>
    %8 = tpu.matmul %0, %7, %cst_9 {dimension_numbers = #tpu.dot_dimension_numbers<[1], [0], [0], [1], [0, 0, 1, 1], [], []>} : vector<64x64xf32>, vector<64x128xf32>, vector<64x128xf32> -> vector<64x128xf32>
    %cst_10 = arith.constant 0.000000e+00 : f32
    %9 = vector.broadcast %cst_10 : f32 to vector<64x128xf32>
    %10 = arith.maximumf %8, %9 : vector<64x128xf32>
    %cst_11 = arith.constant dense<0.000000e+00> : vector<64x128xf32>
    %11 = tpu.matmul %10, %3, %cst_11 {dimension_numbers = #tpu.dot_dimension_numbers<[1], [0], [0], [1], [0, 0, 1, 1], [], []>} : vector<64x128xf32>, vector<128x128xf32>, vector<64x128xf32> -> vector<64x128xf32>
    %cst_12 = arith.constant dense<0.000000e+00> : vector<64x128xf32>
    %12 = tpu.matmul %0, %11, %cst_12 {dimension_numbers = #tpu.dot_dimension_numbers<[1], [0], [0], [1], [0, 0, 1, 1], [], []>} : vector<64x64xf32>, vector<64x128xf32>, vector<64x128xf32> -> vector<64x128xf32>
    %c0_13 = arith.constant 0 : index
    %c0_14 = arith.constant 0 : index
    %13 = vector.load %arg4[%c0_13, %c0_14] : memref<64x128xf32, #tpu.memory_space<vmem>>, vector<64x128xf32>
    tpu.vector_store %arg4[%c0_13, %c0_14], %12 {strides = array<i32>} : memref<64x128xf32, #tpu.memory_space<vmem>>, vector<64x128xf32>,
    return
  }
}

</mosaic_0001>

<bundles_post_ra>
// kernel: tpu_custom_call.1
= control target key start
LH: loop header
LB: loop body
LE: loop exit
PB: predicated region body
PF: predicated region fallthrough
CT: control target
= control target key end

     0   :  { %9 = vsyncpa [#allocation3], 0  ;;  %s1428_s0 = inlined_call_operand.hbm [shape: f32[64,64], index: 0, kind: input, shape index: {}]   ;;  %s1429_s1 = inlined_call_operand.hbm [shape: f32[64,128], index: 1, kind: input, shape index: {}]   ;;  %s1430_s2 = inlined_call_operand.hbm [shape: f32[128,128], index: 2, kind: input, shape index: {}]   ;;  %s1431_s3 = inlined_call_operand.hbm [shape: f32[128,128], index: 3, kind: input, shape index: {}]   ;;  %s1432_s4 = inlined_call_operand.hbm [shape: f32[64,128], index: 4, kind: output, shape index: {}]  }
   0x1   :  { %10 = vsyncpa [#allocation6], 0 }
   0x2   :  { %11 = vsyncpa [#allocation9], 0 }
   0x3   :  { %12 = vsyncpa [#allocation4], 0  ;;  %s1243_s15 = smov [#allocation5]   ;;  %s1244_s17 = smov [#allocation2]  }
   0x4   :  { %s30_s16 = sshll.u32 %s1243_s15, 4  ;;  %s18_s18 = sshll.u32 %s1244_s17, 4  ;;  %s31_s16 = int_to_ptr.vmem [resolvable:$true] %s30_s16  ;;  %s1275_s18 = int_to_ptr.vmem [resolvable:$true] %s18_s18 }
   0x5   :  { %s1125_s21 = scalar_lea.hbm %s1429_s1, 1024 }
   0x6   :  { %p1126_p0 = scmp.ne.s32.totalorder %s1429_s1, %s1125_s21  ;;  %p1129_p1 = scmp.lt.u32.totalorder %s1125_s21, %s1429_s1 }
   0x8   :  { %p1131_p2 = pnand %p1129_p1, %p1126_p0 }
   0xa   :  { %1134 = shalt.err (!%p1131_p2)
}
   0xb   :  { %s1135_s26 = scalar_lea.vmem %s31_s16, 1024  ;;  %p1140_p4 = scmp.lt.s32.totalorder %s31_s16, %s31_s16 }
   0xc   :  { %p1136_p3 = scmp.ne.s32.totalorder %s31_s16, %s1135_s26  ;;  %p1141_p5 = scmp.lt.s32.totalorder %s1135_s26, %s1135_s26 }
   0xe   :  { %p1142_p6 = por %p1141_p5, %p1140_p4 }
  0x10   :  { %p1143_p7 = pnand %p1142_p6, %p1136_p3 }
  0x12   :  { %1146 = shalt.err (!%p1143_p7)
}
  0x13   :  { %s1245_s27 = smov 128   ;;  %s1246_s28 = smov 8  }
  0x14   :  { %36 = dma.hbm_to_vmem [thread:$0]  %s1429_s1, 1024, %s31_s16, [#allocation6], %s1245_s27, %s1245_s27, %s1246_s28  }
  0x15   :  { %s1147_s7 = scalar_lea.hbm %s1428_s0, 1024 }
  0x16   :  { %p1148_p8 = scmp.ne.s32.totalorder %s1428_s0, %s1147_s7  ;;  %p1151_p9 = scmp.lt.u32.totalorder %s1147_s7, %s1428_s0 }
  0x18   :  { %p1153_p10 = pnand %p1151_p9, %p1148_p8 }
  0x1a   :  { %1156 = shalt.err (!%p1153_p10)
}
  0x1b   :  { %s1157_s12 = scalar_lea.vmem %s1275_s18, 1024  ;;  %p1162_p12 = scmp.lt.s32.totalorder %s1275_s18, %s1275_s18 }
  0x1c   :  { %p1158_p11 = scmp.ne.s32.totalorder %s1275_s18, %s1157_s12  ;;  %p1163_p13 = scmp.lt.s32.totalorder %s1157_s12, %s1157_s12 }
  0x1e   :  { %p1164_p0 = por %p1163_p13, %p1162_p12 }
  0x20   :  { %p1165_p1 = pnand %p1164_p0, %p1158_p11 }
  0x22   :  { %1168 = shalt.err (!%p1165_p1)
}
  0x23   :  { %24 = dma.hbm_to_vmem [thread:$0]  %s1428_s0, 1024, %s1275_s18, [#allocation3], %s1245_s27, %s1245_s27, %s1246_s28  }
  0x24   :  { %s1247_s14 = smov [#allocation7]   ;;  %s1248_s16 = smov [#allocation8]  }
  0x25   :  { %s42_s15 = sshll.u32 %s1247_s14, 4  ;;  %s54_s17 = sshll.u32 %s1248_s16, 4  ;;  %s43_s15 = int_to_ptr.vmem [resolvable:$true] %s42_s15  ;;  %s1312_s17 = int_to_ptr.vmem [resolvable:$true] %s54_s17 }
  0x26   :  { %s1169_s21 = scalar_lea.hbm %s1430_s2, 2048 }
  0x27   :  { %p1170_p2 = scmp.ne.s32.totalorder %s1430_s2, %s1169_s21  ;;  %p1173_p3 = scmp.lt.u32.totalorder %s1169_s21, %s1430_s2 }
  0x29   :  { %p1175_p4 = pnand %p1173_p3, %p1170_p2 }
  0x2b   :  { %1178 = shalt.err (!%p1175_p4)
}
  0x2c   :  { %s1179_s0 = scalar_lea.vmem %s43_s15, 2048  ;;  %p1184_p6 = scmp.lt.s32.totalorder %s43_s15, %s43_s15 }
  0x2d   :  { %p1180_p5 = scmp.ne.s32.totalorder %s43_s15, %s1179_s0  ;;  %p1185_p7 = scmp.lt.s32.totalorder %s1179_s0, %s1179_s0 }
  0x2f   :  { %p1186_p8 = por %p1185_p7, %p1184_p6 }
  0x31   :  { %p1187_p9 = pnand %p1186_p8, %p1180_p5 }
  0x33   :  { %1190 = shalt.err (!%p1187_p9)
}
  0x34   :  { %48 = dma.hbm_to_vmem [thread:$0]  %s1430_s2, 2048, %s43_s15, [#allocation6], %s1245_s27, %s1245_s27, %s1246_s28  }
  0x35   :  { %s1191_s5 = scalar_lea.hbm %s1431_s3, 2048 }
  0x36   :  { %p1192_p10 = scmp.ne.s32.totalorder %s1431_s3, %s1191_s5  ;;  %p1195_p11 = scmp.lt.u32.totalorder %s1191_s5, %s1431_s3 }
  0x38   :  { %p1197_p12 = pnand %p1195_p11, %p1192_p10 }
  0x3a   :  { %1200 = shalt.err (!%p1197_p12)
}
  0x3b   :  { %s1201_s10 = scalar_lea.vmem %s1312_s17, 2048  ;;  %p1206_p0 = scmp.lt.s32.totalorder %s1312_s17, %s1312_s17 }
  0x3c   :  { %p1202_p13 = scmp.ne.s32.totalorder %s1312_s17, %s1201_s10  ;;  %p1207_p1 = scmp.lt.s32.totalorder %s1201_s10, %s1201_s10 }
  0x3e   :  { %p1208_p2 = por %p1207_p1, %p1206_p0 }
  0x40   :  { %p1209_p3 = pnand %p1208_p2, %p1202_p13 }
  0x42   :  { %1212 = shalt.err (!%p1209_p3)
}
  0x43   :  { %60 = dma.hbm_to_vmem [thread:$0]  %s1431_s3, 2048, %s1312_s17, [#allocation9], %s1245_s27, %s1245_s27, %s1246_s28  }
  0x44   :  { %1235 = dma.done.wait [#allocation3], 1024  }
  0x45   :  { %1236 = vsyncadd [#allocation3], 4294966272 }
  0x46   :  { %1237 = dma.done.wait [#allocation6], 3072  }
  0x47   :  { %1238 = vsyncadd [#allocation6], 4294964224 }
  0x48   :  { %1239 = dma.done.wait [#allocation9], 2048  }
  0x49   :  { %1240 = vsyncadd [#allocation9], 4294965248  ;;  %v81_v0 = vld [vmem:[#allocation5] sm:$0xff]  ;;  %v82_v1 = vld [vmem:[#allocation5 + $0x8] sm:$0xff]  ;;  %vm121_vm0 = vcmask 523264   ;;  %s1249_s3 = smov [#allocation10]  }
  0x4a   :  { %v83_v2 = vld [vmem:[#allocation5 + $0x10] sm:$0xff]  ;;  %v1006_v3 = vpack.c.bf16 %v82_v1, %v81_v0  ;;  %v84_v4 = vld [vmem:[#allocation5 + $0x18] sm:$0xff]  ;;  %v85_v6 = vld [vmem:[#allocation5 + $0x20] sm:$0xff]  ;;  %s700_s12 = sshll.u32 %s1249_s3, 4  ;;  %s701_s12 = int_to_ptr.vmem [resolvable:$true] %s700_s12 }
  0x4b   :  { %v1010_v5 = vpack.c.bf16 %v84_v4, %v83_v2  ;;  %v86_v7 = vld [vmem:[#allocation5 + $0x28] sm:$0xff]  ;;  %v1349_v8 = vld [vmem:[#allocation2] sm:$0xff]  ;;  %v87_v10 = vld [vmem:[#allocation5 + $0x30] sm:$0xff]  ;;  %s1213_s1 = scalar_lea.vmem %s701_s12, 1024  ;;  %p1218_p5 = scmp.lt.s32.totalorder %s701_s12, %s701_s12 }
  0x4c   :  { %1007 = vmatprep.subr.bf16.mxu0 %v1006_v3  ;;  %850 = vmatprep.mubr.msk.f32.mxu0 %vm121_vm0, %v1349_v8  ;;  %v1014_v9 = vpack.c.bf16 %v86_v7, %v85_v6  ;;  %v89_v11 = vld [vmem:[#allocation7] sm:$0xff]  ;;  %v90_v12 = vld [vmem:[#allocation7 + $0x8] sm:$0xff]  ;;  %v88_v13 = vld [vmem:[#allocation5 + $0x38] sm:$0xff]  ;;  %p1214_p4 = scmp.ne.s32.totalorder %s701_s12, %s1213_s1  ;;  %p1219_p6 = scmp.lt.s32.totalorder %s1213_s1, %s1213_s1 }
  0x4d   :  { %1009 = vmatpush3.bf16.msra.mxu0 %v1006_v3  ;;  %v1022_v14 = vpack.c.bf16 %v90_v12, %v89_v11  ;;  %v91_v15 = vld [vmem:[#allocation7 + $0x10] sm:$0xff]  ;;  %v92_v16 = vld [vmem:[#allocation7 + $0x18] sm:$0xff]  ;;  %v93_v18 = vld [vmem:[#allocation7 + $0x20] sm:$0xff]  ;;  %v1018_v20 = vpack.c.bf16 %v88_v13, %v87_v10 }
  0x4e   :  { %1011 = vmatprep.subr.bf16.mxu0 %v1010_v5  ;;  %v1026_v17 = vpack.c.bf16 %v92_v16, %v91_v15  ;;  %v94_v19 = vld [vmem:[#allocation7 + $0x28] sm:$0xff]  ;;  %v95_v22 = vld [vmem:[#allocation7 + $0x30] sm:$0xff]  ;;  %v96_v23 = vld [vmem:[#allocation7 + $0x38] sm:$0xff]  ;;  %p1220_p7 = por %p1219_p6, %p1218_p5 }
  0x4f   :  { %1023 = vmatprep.subr.bf16.mxu1 %v1022_v14  ;;  %v1030_v21 = vpack.c.bf16 %v94_v19, %v93_v18  ;;  %v1034_v24 = vpack.c.bf16 %v96_v23, %v95_v22  ;;  %v97_v25 = vld [vmem:[#allocation7 + $0x40] sm:$0xff]  ;;  %v98_v26 = vld [vmem:[#allocation7 + $0x48] sm:$0xff]  ;;  %v1355_v28 = vld [vmem:[#allocation2 + $0x10] sm:$0xff] }
  0x50   :  { %1025 = vmatpush3.bf16.msra.mxu1 %v1022_v14  ;;  %v1353_v27 = vld [vmem:[#allocation2 + $0x8] sm:$0xff]  ;;  %v1038_v29 = vpack.c.bf16 %v98_v26, %v97_v25  ;;  %v99_v30 = vld [vmem:[#allocation7 + $0x50] sm:$0xff]  ;;  %v100_v31 = vld [vmem:[#allocation7 + $0x58] sm:$0xff]  ;;  %p1221_p8 = pnand %p1220_p7, %p1214_p4 }
  0x51   :  { %1013 = vmatpush3.bf16.msra.mxu0 %v1010_v5  ;;  %1027 = vmatprep.subr.bf16.mxu1 %v1026_v17  ;;  %v1361_v32 = vld [vmem:[#allocation2 + $0x18] sm:$0xff]  ;;  %v1363_v33 = vld [vmem:[#allocation2 + $0x20] sm:$0xff]  ;;  %v1042_v34 = vpack.c.bf16 %v100_v31, %v99_v30  ;;  %v102_v36 = vld [vmem:[#allocation7 + $0x68] sm:$0xff] }
  0x52   :  { %1015 = vmatprep.subr.bf16.mxu0 %v1014_v9  ;;  %v101_v35 = vld [vmem:[#allocation7 + $0x60] sm:$0xff]  ;;  %v1369_v37 = vld [vmem:[#allocation2 + $0x28] sm:$0xff]  ;;  %v1371_v38 = vld [vmem:[#allocation2 + $0x30] sm:$0xff] }
  0x53   :  { %v1046_v39 = vpack.c.bf16 %v102_v36, %v101_v35  ;;  %v1377_v40 = vld [vmem:[#allocation2 + $0x38] sm:$0xff]  ;;  %v103_v41 = vld [vmem:[#allocation7 + $0x70] sm:$0xff]  ;;  %v105_v5 = vld [vmem:[#allocation8] sm:$0xff] }
  0x54   :  { %1029 = vmatpush3.bf16.msra.mxu1 %v1026_v17  ;;  %v104_v42 = vld [vmem:[#allocation7 + $0x78] sm:$0xff]  ;;  %v106_v6 = vld [vmem:[#allocation8 + $0x8] sm:$0xff]  ;;  %v107_v11 = vld [vmem:[#allocation8 + $0x10] sm:$0xff] }
  0x55   :  { %1017 = vmatpush3.bf16.msra.mxu0 %v1014_v9  ;;  %1031 = vmatprep.subr.bf16.mxu1 %v1030_v21  ;;  %v1050_v43 = vpack.c.bf16 %v104_v42, %v103_v41  ;;  %v1070_v10 = vpack.c.bf16 %v106_v6, %v105_v5  ;;  %v108_v12 = vld [vmem:[#allocation8 + $0x18] sm:$0xff]  ;;  %v109_v14 = vld [vmem:[#allocation8 + $0x20] sm:$0xff]  ;;  %v110_v15 = vld [vmem:[#allocation8 + $0x28] sm:$0xff] }
  0x56   :  { %1019 = vmatprep.subr.bf16.mxu0 %v1018_v20  ;;  %v1074_v13 = vpack.c.bf16 %v108_v12, %v107_v11  ;;  %v1078_v16 = vpack.c.bf16 %v110_v15, %v109_v14  ;;  %v111_v17 = vld [vmem:[#allocation8 + $0x30] sm:$0xff]  ;;  %v112_v18 = vld [vmem:[#allocation8 + $0x38] sm:$0xff]  ;;  %v117_v26 = vld [vmem:[#allocation8 + $0x60] sm:$0xff] }
  0x57   :  { %v1082_v19 = vpack.c.bf16 %v112_v18, %v111_v17  ;;  %v115_v23 = vld [vmem:[#allocation8 + $0x50] sm:$0xff] }
  0x58   :  { %1033 = vmatpush3.bf16.msra.mxu1 %v1030_v21  ;;  %v114_v21 = vld [vmem:[#allocation8 + $0x48] sm:$0xff]  ;;  %v119_v31 = vld [vmem:[#allocation8 + $0x70] sm:$0xff] }
  0x59   :  { %1021 = vmatpush3.bf16.msra.mxu0 %v1018_v20  ;;  %1035 = vmatprep.subr.bf16.mxu1 %v1034_v24  ;;  %v113_v20 = vld [vmem:[#allocation8 + $0x40] sm:$0xff] }
  0x5a   :  { %v1086_v22 = vpack.c.bf16 %v114_v21, %v113_v20 }
  0x5c   :  { %851 = vmatmul.mubr.msk.f32.vlgmr.msra.gmra.mrb[0].mxu0 %vm121_vm0, %v1353_v27  ;;  %1037 = vmatpush3.bf16.msra.mxu1 %v1034_v24  ;;  %v116_v24 = vld [vmem:[#allocation8 + $0x58] sm:$0xff] }
  0x5d   :  { %853 = vmatprep.mubr.msk.f32.mxu0 %vm121_vm0, %v1355_v28  ;;  %1039 = vmatprep.subr.bf16.mxu1 %v1038_v29  ;;  %v1090_v25 = vpack.c.bf16 %v116_v24, %v115_v23 }
  0x60   :  { %854 = vmatmul.mubr.msk.f32.gmra.mrb[2].mxu0 %vm121_vm0, %v1361_v32  ;;  %1041 = vmatpush3.bf16.msra.mxu1 %v1038_v29  ;;  %v118_v29 = vld [vmem:[#allocation8 + $0x68] sm:$0xff] }
  0x61   :  { %856 = vmatprep.mubr.msk.f32.mxu0 %vm121_vm0, %v1363_v33  ;;  %1043 = vmatprep.subr.bf16.mxu1 %v1042_v34  ;;  %v1094_v30 = vpack.c.bf16 %v118_v29, %v117_v26 }
  0x64   :  { %857 = vmatmul.mubr.msk.f32.gmra.mrb[4].mxu0 %vm121_vm0, %v1369_v37  ;;  %1045 = vmatpush3.bf16.msra.mxu1 %v1042_v34  ;;  %v120_v34 = vld [vmem:[#allocation8 + $0x78] sm:$0xff] }
  0x65   :  { %859 = vmatprep.mubr.msk.f32.mxu0 %vm121_vm0, %v1371_v38  ;;  %1047 = vmatprep.subr.bf16.mxu1 %v1046_v39  ;;  %v1098_v35 = vpack.c.bf16 %v120_v34, %v119_v31 }
  0x68   :  { %860 = vmatmul.mubr.msk.f32.gmra.mrb[6].mxu0 %vm121_vm0, %v1377_v40  ;;  %1049 = vmatpush3.bf16.msra.mxu1 %v1046_v39 }
  0x69   :  { %922 = vmatprep.mubr.msk.f32.mxu0 %vm121_vm0, %v1349_v8  ;;  %1051 = vmatprep.subr.bf16.mxu1 %v1050_v43 }
  0x6c   :  { %1053 = vmatpush3.bf16.msra.mxu1 %v1050_v43 }
 0x12f   :  { %v852_v44 = vpop.f32.mrb[0].mxu0 }
 0x130   :  { %v212_v45 = vpop.f32.mrb[1].mxu0  ;;  %v252_v47 = vmax.f32 %v852_v44, 0.0 }
 0x131   :  { %v251_v46 = vmax.f32 %v212_v45, 0.0 }
 0x133   :  { %v855_v48 = vpop.f32.mrb[2].mxu0  ;;  %894 = vmatprep.mubr.f32.mxu1 %v251_v46 }
 0x134   :  { %v222_v49 = vpop.f32.mrb[3].mxu0  ;;  %895 = vmatmul.mubr.f32.vlgmr.msra.gmra.mrb[0].mxu1 %v252_v47  ;;  %v254_v51 = vmax.f32 %v855_v48, 0.0 }
 0x135   :  { %v253_v50 = vmax.f32 %v222_v49, 0.0 }
 0x137   :  { %v858_v52 = vpop.f32.mrb[4].mxu0  ;;  %897 = vmatprep.mubr.f32.mxu1 %v253_v50 }
 0x138   :  { %v232_v53 = vpop.f32.mrb[5].mxu0  ;;  %898 = vmatmul.mubr.f32.gmra.mrb[2].mxu1 %v254_v51  ;;  %v256_v55 = vmax.f32 %v858_v52, 0.0 }
 0x139   :  { %v255_v54 = vmax.f32 %v232_v53, 0.0 }
 0x13b   :  { %v861_v56 = vpop.f32.mrb[6].mxu0  ;;  %900 = vmatprep.mubr.f32.mxu1 %v255_v54 }
 0x13c   :  { %v242_v57 = vpop.f32.mrb[7].mxu0  ;;  %901 = vmatmul.mubr.f32.gmra.mrb[4].mxu1 %v256_v55  ;;  %v258_v59 = vmax.f32 %v861_v56, 0.0 }
 0x13d   :  { %v257_v58 = vmax.f32 %v242_v57, 0.0 }
 0x13f   :  { %903 = vmatprep.mubr.f32.mxu1 %v257_v58 }
 0x140   :  { %904 = vmatmul.mubr.f32.gmra.mrb[6].mxu1 %v258_v59 }
 0x141   :  { %994 = vmatprep.mubr.msk.f32.mxu1 %vm121_vm0, %v1349_v8 }
 0x207   :  { %v896_v60 = vpop.f32.mrb[0].mxu1 }
 0x208   :  { %v325_v61 = vpop.f32.mrb[1].mxu1 }
 0x209   :  { %v1054_v62 = vpack.c.bf16 %v896_v60, %v325_v61 }
 0x20b   :  { %v899_v63 = vpop.f32.mrb[2].mxu1  ;;  %1055 = vmatprep.subr.bf16.mxu0 %v1054_v62 }
 0x20c   :  { %v335_v0 = vpop.f32.mrb[3].mxu1  ;;  %1057 = vmatpush3.bf16.msra.mxu0 %v1054_v62 }
 0x20d   :  { %v1058_v1 = vpack.c.bf16 %v899_v63, %v335_v0 }
 0x20f   :  { %v902_v2 = vpop.f32.mrb[4].mxu1  ;;  %1059 = vmatprep.subr.bf16.mxu0 %v1058_v1 }
 0x210   :  { %v345_v3 = vpop.f32.mrb[5].mxu1  ;;  %1061 = vmatpush3.bf16.msra.mxu0 %v1058_v1 }
 0x211   :  { %v1062_v4 = vpack.c.bf16 %v902_v2, %v345_v3 }
 0x213   :  { %v905_v7 = vpop.f32.mrb[6].mxu1  ;;  %1063 = vmatprep.subr.bf16.mxu0 %v1062_v4 }
 0x214   :  { %v355_v9 = vpop.f32.mrb[7].mxu1  ;;  %1065 = vmatpush3.bf16.msra.mxu0 %v1062_v4 }
 0x215   :  { %v1066_v8 = vpack.c.bf16 %v905_v7, %v355_v9 }
 0x217   :  { %1067 = vmatprep.subr.bf16.mxu0 %v1066_v8 }
 0x218   :  { %1069 = vmatpush3.bf16.msra.mxu0 %v1066_v8 }
 0x219   :  { %1071 = vmatprep.subr.bf16.mxu0 %v1070_v10 }
 0x21b   :  { %923 = vmatmul.mubr.msk.f32.vlgmr.msra.gmra.mrb[8].mxu0 %vm121_vm0, %v1353_v27 }
 0x21c   :  { %925 = vmatprep.mubr.msk.f32.mxu0 %vm121_vm0, %v1355_v28  ;;  %1073 = vmatpush3.bf16.msra.mxu0 %v1070_v10 }
 0x21d   :  { %1075 = vmatprep.subr.bf16.mxu0 %v1074_v13 }
 0x21f   :  { %926 = vmatmul.mubr.msk.f32.gmra.mrb[10].mxu0 %vm121_vm0, %v1361_v32 }
 0x220   :  { %928 = vmatprep.mubr.msk.f32.mxu0 %vm121_vm0, %v1363_v33  ;;  %1077 = vmatpush3.bf16.msra.mxu0 %v1074_v13 }
 0x221   :  { %1079 = vmatprep.subr.bf16.mxu0 %v1078_v16 }
 0x223   :  { %929 = vmatmul.mubr.msk.f32.gmra.mrb[12].mxu0 %vm121_vm0, %v1369_v37 }
 0x224   :  { %931 = vmatprep.mubr.msk.f32.mxu0 %vm121_vm0, %v1371_v38  ;;  %1081 = vmatpush3.bf16.msra.mxu0 %v1078_v16 }
 0x225   :  { %1083 = vmatprep.subr.bf16.mxu0 %v1082_v19 }
 0x227   :  { %932 = vmatmul.mubr.msk.f32.gmra.mrb[14].mxu0 %vm121_vm0, %v1377_v40 }
 0x228   :  { %1085 = vmatpush3.bf16.msra.mxu0 %v1082_v19 }
 0x229   :  { %1087 = vmatprep.subr.bf16.mxu0 %v1086_v22 }
 0x22c   :  { %1089 = vmatpush3.bf16.msra.mxu0 %v1086_v22 }
 0x22d   :  { %1091 = vmatprep.subr.bf16.mxu0 %v1090_v25 }
 0x230   :  { %1093 = vmatpush3.bf16.msra.mxu0 %v1090_v25 }
 0x231   :  { %1095 = vmatprep.subr.bf16.mxu0 %v1094_v30 }
 0x234   :  { %1097 = vmatpush3.bf16.msra.mxu0 %v1094_v30 }
 0x235   :  { %1099 = vmatprep.subr.bf16.mxu0 %v1098_v35 }
 0x238   :  { %1101 = vmatpush3.bf16.msra.mxu0 %v1098_v35 }
 0x2ee   :  { %v924_v36 = vpop.f32.mrb[8].mxu0 }
 0x2ef   :  { %v430_v39 = vpop.f32.mrb[9].mxu0  ;;  %v470_v42 = vmax.f32 %v924_v36, 0.0 }
 0x2f0   :  { %v469_v41 = vmax.f32 %v430_v39, 0.0 }
 0x2f2   :  { %v927_v43 = vpop.f32.mrb[10].mxu0  ;;  %966 = vmatprep.mubr.f32.mxu0 %v469_v41 }
 0x2f3   :  { %v440_v44 = vpop.f32.mrb[11].mxu0  ;;  %967 = vmatmul.mubr.f32.vlgmr.msra.gmra.mrb[16].mxu0 %v470_v42  ;;  %v472_v46 = vmax.f32 %v927_v43, 0.0 }
 0x2f4   :  { %v471_v45 = vmax.f32 %v440_v44, 0.0 }
 0x2f6   :  { %v930_v47 = vpop.f32.mrb[12].mxu0  ;;  %969 = vmatprep.mubr.f32.mxu0 %v471_v45 }
 0x2f7   :  { %v450_v48 = vpop.f32.mrb[13].mxu0  ;;  %970 = vmatmul.mubr.f32.gmra.mrb[18].mxu0 %v472_v46  ;;  %v474_v50 = vmax.f32 %v930_v47, 0.0 }
 0x2f8   :  { %v473_v49 = vmax.f32 %v450_v48, 0.0 }
 0x2fa   :  { %v933_v51 = vpop.f32.mrb[14].mxu0  ;;  %972 = vmatprep.mubr.f32.mxu0 %v473_v49 }
 0x2fb   :  { %v460_v52 = vpop.f32.mrb[15].mxu0  ;;  %973 = vmatmul.mubr.f32.gmra.mrb[20].mxu0 %v474_v50  ;;  %v476_v54 = vmax.f32 %v933_v51, 0.0 }
 0x2fc   :  { %v475_v53 = vmax.f32 %v460_v52, 0.0 }
 0x2fe   :  { %975 = vmatprep.mubr.f32.mxu0 %v475_v53 }
 0x2ff   :  { %976 = vmatmul.mubr.f32.gmra.mrb[22].mxu0 %v476_v54 }
 0x3c6   :  { %v968_v55 = vpop.f32.mrb[16].mxu0 }
 0x3c7   :  { %v543_v56 = vpop.f32.mrb[17].mxu0 }
 0x3c8   :  { %v1102_v57 = vpack.c.bf16 %v968_v55, %v543_v56 }
 0x3ca   :  { %v971_v58 = vpop.f32.mrb[18].mxu0  ;;  %1103 = vmatprep.subr.bf16.mxu1 %v1102_v57 }
 0x3cb   :  { %v553_v59 = vpop.f32.mrb[19].mxu0  ;;  %1105 = vmatpush3.bf16.msra.mxu1 %v1102_v57 }
 0x3cc   :  { %v1106_v60 = vpack.c.bf16 %v971_v58, %v553_v59 }
 0x3ce   :  { %v974_v61 = vpop.f32.mrb[20].mxu0  ;;  %1107 = vmatprep.subr.bf16.mxu1 %v1106_v60 }
 0x3cf   :  { %v563_v62 = vpop.f32.mrb[21].mxu0  ;;  %1109 = vmatpush3.bf16.msra.mxu1 %v1106_v60 }
 0x3d0   :  { %v1110_v63 = vpack.c.bf16 %v974_v61, %v563_v62 }
 0x3d2   :  { %v977_v0 = vpop.f32.mrb[22].mxu0  ;;  %1111 = vmatprep.subr.bf16.mxu1 %v1110_v63 }
 0x3d3   :  { %v573_v1 = vpop.f32.mrb[23].mxu0  ;;  %1113 = vmatpush3.bf16.msra.mxu1 %v1110_v63 }
 0x3d4   :  { %v1114_v2 = vpack.c.bf16 %v977_v0, %v573_v1 }
 0x3d6   :  { %1115 = vmatprep.subr.bf16.mxu1 %v1114_v2 }
 0x3d7   :  { %1117 = vmatpush3.bf16.msra.mxu1 %v1114_v2 }
 0x3da   :  { %995 = vmatmul.mubr.msk.f32.vlgmr.msra.gmra.mrb[8].mxu1 %vm121_vm0, %v1353_v27 }
 0x3db   :  { %997 = vmatprep.mubr.msk.f32.mxu1 %vm121_vm0, %v1355_v28 }
 0x3de   :  { %998 = vmatmul.mubr.msk.f32.gmra.mrb[10].mxu1 %vm121_vm0, %v1361_v32 }
 0x3df   :  { %1000 = vmatprep.mubr.msk.f32.mxu1 %vm121_vm0, %v1363_v33 }
 0x3e2   :  { %1001 = vmatmul.mubr.msk.f32.gmra.mrb[12].mxu1 %vm121_vm0, %v1369_v37 }
 0x3e3   :  { %1003 = vmatprep.mubr.msk.f32.mxu1 %vm121_vm0, %v1371_v38 }
 0x3e6   :  { %1004 = vmatmul.mubr.msk.f32.gmra.mrb[14].mxu1 %vm121_vm0, %v1377_v40 }
 0x4ad   :  { %v996_v3 = vpop.f32.mrb[8].mxu1 }
 0x4ae   :  { %688 = vst [vmem:[#allocation10 + $0x8] sm:$0xff] %v996_v3  ;;  %v648_v27 = vpop.f32.mrb[9].mxu1 }
 0x4af   :  { %687 = vst [vmem:[#allocation10] sm:$0xff] %v648_v27 }
 0x4b1   :  { %v999_v28 = vpop.f32.mrb[10].mxu1 }
 0x4b2   :  { %690 = vst [vmem:[#allocation10 + $0x18] sm:$0xff] %v999_v28  ;;  %v658_v4 = vpop.f32.mrb[11].mxu1 }
 0x4b3   :  { %689 = vst [vmem:[#allocation10 + $0x10] sm:$0xff] %v658_v4 }
 0x4b5   :  { %v1002_v32 = vpop.f32.mrb[12].mxu1 }
 0x4b6   :  { %692 = vst [vmem:[#allocation10 + $0x28] sm:$0xff] %v1002_v32  ;;  %v668_v33 = vpop.f32.mrb[13].mxu1 }
 0x4b7   :  { %691 = vst [vmem:[#allocation10 + $0x20] sm:$0xff] %v668_v33 }
 0x4b9   :  { %v1005_v37 = vpop.f32.mrb[14].mxu1 }
 0x4ba   :  { %694 = vst [vmem:[#allocation10 + $0x38] sm:$0xff] %v1005_v37  ;;  %v678_v38 = vpop.f32.mrb[15].mxu1 }
 0x4bb   :  { %693 = vst [vmem:[#allocation10 + $0x30] sm:$0xff] %v678_v38 }
 0x4bc   :  { %1224 = shalt.err (!%p1221_p8)
}
 0x4bd   :  { %s1225_s15 = scalar_lea.hbm %s1432_s4, 1024 }
 0x4be   :  { %p1226_p9 = scmp.ne.s32.totalorder %s1432_s4, %s1225_s15  ;;  %p1229_p10 = scmp.lt.u32.totalorder %s1225_s15, %s1432_s4 }
 0x4c0   :  { %p1231_p11 = pnand %p1229_p10, %p1226_p9 }
 0x4c2   :  { %1234 = shalt.err (!%p1231_p11)
}
 0x4c3   :  { %706 = dma.vmem_to_hbm [thread:$0]  %s701_s12, 1024, %s1432_s4, [#allocation4], %s1245_s27, %s1245_s27, %s1246_s28  }
 0x4c4   :  { %1241 = dma.done.wait [#allocation4], 1024  }
 0x4c5   :  { %1242 = vsyncadd [#allocation4], 4294966272 }
 0x4c6   :  { %710 = vsyncpa [#allocation3], 1 }
 0x4c7   :  { %711 = vsyncpa [#allocation6], 1 }
 0x4c8   :  { %712 = vsyncpa [#allocation9], 1 }
 0x4c9   :  { %713 = vsyncpa [#allocation4], 1 }

</bundles_post_ra>
